<compile_context>
chip_gen: v5e
topology: v5e:2x2
jax: 0.10.0
libtpu: 0.0.40
codegen_flags: <defaults>
</compile_context>

<pallas_src>
import functools

import jax
import jax.numpy as jnp
from jax import lax
from jax.experimental import pallas as pl
from jax.experimental.pallas import tpu as pltpu

_NEG_INF = -1e30  # large-negative fill; softmax math stays f32


def _make_kernel(has_ll, has_kvec, needs_kv_mask, seq_len, kv_block, mxu_dtype):
    """Kernel specialized on which additive score terms exist.

    Ref order: q, k, v, [ll], [kvec], out, m_sc, l_sc, acc_sc
      q    : (1, TQ, D)   query tile (native dtype)
      k, v : (1, TK, D)   key / value tile (native dtype)
      ll   : (1, TQ, TK)  additive bias and/or mask slab (native/bf16 dtype)
      kvec : (1, 1,  TK)  additive key-padding vector (f32, 0 / -1e30)
      out  : (1, TQ, D)
      m_sc : (TQ, 1) f32  running row max
      l_sc : (TQ, 1) f32  running row sum (unnormalized)
      acc  : (TQ, D) f32  running P @ V accumulator
    """

    def kernel(*refs):
        it = iter(refs)
        q_ref = next(it)
        k_ref = next(it)
        v_ref = next(it)
        ll_ref = next(it) if has_ll else None
        kvec_ref = next(it) if has_kvec else None
        o_ref = next(it)
        m_sc = next(it)
        l_sc = next(it)
        acc_sc = next(it)

        ki = pl.program_id(2)

        @pl.when(ki == 0)
        def _():
            m_sc[...] = jnp.full_like(m_sc[...], _NEG_INF)
            l_sc[...] = jnp.zeros_like(l_sc[...])
            acc_sc[...] = jnp.zeros_like(acc_sc[...])

        q = q_ref[0]                       # (TQ, D)
        k = k_ref[0]                       # (TK, D)
        v = v_ref[0]                       # (TK, D)

        d = q.shape[-1]
        inv_scale = 1.0 / (float(d) ** 0.5)

        # Fold 1/sqrt(d) into the small (TQ, D) tile; contract last axes so K
        # stays in its natural (TK, D) layout (no explicit transpose).
        qs = (q * inv_scale).astype(mxu_dtype)
        score = lax.dot_general(
            qs, k.astype(mxu_dtype),
            dimension_numbers=(((1,), (1,)), ((), ())),
            preferred_element_type=jnp.float32,
        )                                   # (TQ, TK) f32

        if has_ll:
            score = score + ll_ref[0].astype(jnp.float32)   # (TQ, TK)
        if has_kvec:
            score = score + kvec_ref[0].astype(jnp.float32)  # (1, TK) bcast

        if needs_kv_mask:
            # Last key block may run past seq_len: neutralize padded columns
            # (and padded V rows, so garbage never reaches the accumulator).
            kpos = ki * kv_block + lax.broadcasted_iota(
                jnp.int32, (1, kv_block), 1)
            score = jnp.where(kpos < seq_len, score, _NEG_INF)
            vpos = ki * kv_block + lax.broadcasted_iota(
                jnp.int32, (kv_block, 1), 0)
            v = jnp.where(vpos < seq_len, v, jnp.zeros_like(v))

        # Online softmax update (f32); P stays UNnormalized.
        m_prev = m_sc[...]                                   # (TQ, 1)
        m_new = jnp.maximum(m_prev, jnp.max(score, axis=-1, keepdims=True))
        alpha = jnp.exp(m_prev - m_new)                      # (TQ, 1)
        p = jnp.exp(score - m_new)                           # (TQ, TK)
        l_sc[...] = alpha * l_sc[...] + jnp.sum(p, axis=-1, keepdims=True)
        acc_sc[...] = alpha * acc_sc[...] + jnp.dot(
            p.astype(mxu_dtype), v.astype(mxu_dtype),
            preferred_element_type=jnp.float32)
        m_sc[...] = m_new

        @pl.when(ki == pl.num_programs(2) - 1)
        def _():
            # Deferred normalization: scale the (TQ, D) accumulator instead of
            # the (TQ, TK) probabilities.
            o_ref[0] = (acc_sc[...] *
                        pl.reciprocal(l_sc[...], approx=True)
                        ).astype(o_ref.dtype)

    return kernel


def _select_tiles(l, d, q_bytes, ll_bytes, has_ll, has_kvec,
                  query_block, kv_block):
    """VMEM-aware (tq, tk) selection (conservative across v5e/v6e/v7x)."""
    budget = 24 * 1024 * 1024

    def footprint(tq, tk):
        fp = 2 * tq * d * q_bytes              # q (double-buffered)
        fp += 2 * 2 * tk * d * q_bytes         # k, v
        fp += 2 * tq * d * q_bytes             # out
        if has_ll:
            fp += 2 * tq * tk * ll_bytes       # additive slab
        if has_kvec:
            fp += 2 * tk * 4                   # key-padding vector
        fp += tq * d * 4 + 2 * tq * 4          # f32 accumulator + m/l scratch
        fp += 4 * tq * tk * 4                  # score-sized f32 temporaries
        return fp

    tq = min(l, 512) if query_block is None else min(query_block, l)
    tk = l if kv_block is None else min(kv_block, l)

    if query_block is None:
        # Shrink the query tile first (keeps K/V resident across query tiles).
        while tq > 128 and footprint(tq, tk) > budget:
            tq //= 2
    if kv_block is None:
        # Then stream the key axis (flash-style) for long sequences.
        while tk > 512 and footprint(tq, tk) > budget:
            tk = max(512, tk // 2)
            tk = ((tk + 511) // 512) * 512     # keep the kv block lane-friendly
    return tq, tk


@functools.partial(
    jax.jit, static_argnames=("matmul_in_bf16", "query_block", "kv_block"))
def self_attention(Q, K, V, attention_mask=None, attention_bias=None, *,
                   matmul_in_bf16=False, query_block=None, kv_block=None):
    """Mirrors SelfAttention.forward (dropout p=0.0).

    Q/K/V: (b, l, d) or (b, h, l, d)
    attention_mask: (b, l) or (b, l, l); 1 = valid, 0 = invalid (optional)
    attention_bias: (b, l, l) or (b, h, l, l) (optional)
    Returns: same shape as Q.
    """
    orig_shape = Q.shape
    if Q.ndim == 3:
        b, l, d = Q.shape
        h = 1
        Qf, Kf, Vf = Q[:, None], K[:, None], V[:, None]
    else:
        b, h, l, d = Q.shape
        Qf, Kf, Vf = Q, K, V
    bh = b * h

    neg = jnp.float32(_NEG_INF)

    # ---- build only the additive score terms that actually exist ----------
    ll_add = None            # (b, l, l) or (b, h, l, l) additive slab
    ll_per_head = False
    kvec_add = None          # (b, 1, l) f32 additive key-padding vector

    if attention_bias is not None:
        ll_add = attention_bias                      # keep native dtype in HBM
        ll_per_head = attention_bias.ndim == 4
        if Q.dtype == jnp.bfloat16 and ll_add.dtype == jnp.float32:
            # bf16 pipeline: halve the dominant HBM stream (f32 add in-kernel).
            ll_add = ll_add.astype(jnp.bfloat16)

    if attention_mask is not None:
        am = attention_mask
        if am.ndim == 2:                             # (b, l) key-padding mask
            if ll_add is not None:
                # Fold into the existing slab: one fewer DMA stream and one
                # fewer (TQ, TK) add per grid step.
                pad = jnp.where(am > 0, 0.0, neg).astype(ll_add.dtype)
                if ll_per_head:
                    ll_add = ll_add + pad[:, None, None, :]
                else:
                    ll_add = ll_add + pad[:, None, :]
            else:
                kvec_add = jnp.where(am > 0, 0.0, neg)[:, None, :]  # (b,1,l)
        else:                                        # (b, l, l) full mask
            if ll_add is None:
                # Mask-only slab: {0, -1e30} is fine in bf16 -> half the DMA.
                ll_add = jnp.where(am > 0, 0.0, neg).astype(jnp.bfloat16)
            else:
                pad = jnp.where(am > 0, 0.0, neg).astype(ll_add.dtype)
                if ll_per_head:
                    ll_add = ll_add + pad[:, None, :, :]
                else:
                    ll_add = ll_add + pad

    q3 = Qf.reshape(bh, l, d)
    k3 = Kf.reshape(bh, l, d)
    v3 = Vf.reshape(bh, l, d)

    has_ll = ll_add is not None
    has_kvec = kvec_add is not None

    q_bytes = jnp.dtype(Q.dtype).itemsize
    ll_bytes = jnp.dtype(ll_add.dtype).itemsize if has_ll else 0

    tq, tk = _select_tiles(l, d, q_bytes, ll_bytes, has_ll, has_kvec,
                           query_block, kv_block)
    n_q = pl.cdiv(l, tq)
    n_k = pl.cdiv(l, tk)
    needs_kv_mask = (l % tk) != 0

    mxu_dtype = (jnp.bfloat16
                 if (matmul_in_bf16 and Q.dtype == jnp.float32)
                 else Q.dtype)

    in_arrays = [q3, k3, v3]
    in_specs = [
        pl.BlockSpec((1, tq, d), lambda i, qi, ki: (i, qi, 0)),
        pl.BlockSpec((1, tk, d), lambda i, qi, ki: (i, ki, 0)),
        pl.BlockSpec((1, tk, d), lambda i, qi, ki: (i, ki, 0)),
    ]

    if has_ll:
        if ll_per_head:
            ll3 = ll_add.reshape(bh, l, l)
            ll_map = lambda i, qi, ki: (i, qi, ki)
        else:
            ll3 = ll_add                                   # (b, l, l)
            ll_map = lambda i, qi, ki: (i // h, qi, ki)
        in_arrays.append(ll3)
        in_specs.append(pl.BlockSpec((1, tq, tk), ll_map))

    if has_kvec:
        in_arrays.append(kvec_add)                         # (b, 1, l)
        in_specs.append(
            pl.BlockSpec((1, 1, tk), lambda i, qi, ki: (i // h, 0, ki)))

    kernel = _make_kernel(has_ll=has_ll, has_kvec=has_kvec,
                          needs_kv_mask=needs_kv_mask, seq_len=l,
                          kv_block=tk, mxu_dtype=mxu_dtype)

    out = pl.pallas_call(
        kernel,
        out_shape=jax.ShapeDtypeStruct((bh, l, d), Q.dtype),
        grid_spec=pltpu.PrefetchScalarGridSpec(
            num_scalar_prefetch=0,
            grid=(bh, n_q, n_k),
            in_specs=in_specs,
            out_specs=pl.BlockSpec((1, tq, d), lambda i, qi, ki: (i, qi, 0)),
            scratch_shapes=[
                pltpu.VMEM((tq, 1), jnp.float32),   # running max
                pltpu.VMEM((tq, 1), jnp.float32),   # running sum
                pltpu.VMEM((tq, d), jnp.float32),   # P @ V accumulator
            ],
        ),
        compiler_params=pltpu.CompilerParams(
            dimension_semantics=("parallel", "arbitrary", "arbitrary"),
            vmem_limit_bytes=48 * 1024 * 1024),
    )(*in_arrays)

    return out.reshape(orig_shape)


def _reference(Q, K, V, attention_mask=None, attention_bias=None):
    scale = Q.shape[-1] ** 0.5
    score = jnp.einsum("...ld,...kd->...lk", Q, K).astype(jnp.float32) / scale
    if attention_bias is not None:
        ab = attention_bias
        if Q.ndim == 4 and ab.ndim == 3:
            ab = ab[:, None, :, :]
        score = score + ab
    if attention_mask is not None:
        am = attention_mask
        if am.ndim == 2:
            am = am[:, None, :]
        if Q.ndim == 4:
            am = am[:, None, :, :]
        score = jnp.where(am > 0, score, _NEG_INF)
    w = jax.nn.softmax(score, axis=-1)
    return jnp.einsum("...lk,...kd->...ld", w, V).astype(Q.dtype)


if __name__ == "__main__":
    key = jax.random.PRNGKey(0)
    kq, kk, kv, kb, km = jax.random.split(key, 5)

    b, h, l, d = 2, 2, 8, 32
    Q = jax.random.normal(kq, (b, h, l, d), dtype=jnp.float32)
    K = jax.random.normal(kk, (b, h, l, d), dtype=jnp.float32)
    V = jax.random.normal(kv, (b, h, l, d), dtype=jnp.float32)
    attention_bias = 0.1 * jax.random.normal(kb, (b, h, l, l), dtype=jnp.float32)
    # (b, l) key-padding mask, 1 = valid, 0 = invalid; keep >= 1 valid key.
    attention_mask = (jax.random.uniform(km, (b, l)) > 0.3).astype(jnp.float32)
    attention_mask = attention_mask.at[:, 0].set(1.0)

    # 1) per-head bias + (b, l) key-padding mask (mask folded into the slab)
    out = jax.block_until_ready(
        self_attention(Q, K, V, attention_mask, attention_bias))
    ref = _reference(Q, K, V, attention_mask, attention_bias)
    assert out.shape == Q.shape
    assert jnp.allclose(out, ref, atol=2e-3, rtol=2e-3), "mismatch (bias+mask)"

    # 2) plain path (no bias, no mask) -> minimal-input kernel
    out2 = jax.block_until_ready(self_attention(Q, K, V))
    ref2 = _reference(Q, K, V)
    assert jnp.allclose(out2, ref2, atol=2e-3, rtol=2e-3), "mismatch (plain)"

    # 3) (b, l, d) rank with a (b, l, l) mask -> mask-only bf16 slab
    Q3, K3, V3 = Q[:, 0], K[:, 0], V[:, 0]
    mask3 = jnp.ones((b, l, l), jnp.float32).at[:, :, -2:].set(0.0)
    out3 = jax.block_until_ready(self_attention(Q3, K3, V3, mask3))
    ref3 = _reference(Q3, K3, V3, mask3)
    assert out3.shape == Q3.shape
    assert jnp.allclose(out3, ref3, atol=2e-3, rtol=2e-3), "mismatch (3d-rank)"

    # 4) (b, l) key-padding mask only -> small kvec stream (no slab built)
    out4 = jax.block_until_ready(self_attention(Q, K, V, attention_mask))
    ref4 = _reference(Q, K, V, attention_mask)
    assert jnp.allclose(out4, ref4, atol=2e-3, rtol=2e-3), "mismatch (kvec)"

    # 5) key-streaming path: forced kv/query blocks, online softmax across kv
    #    blocks, padded kv tail masked (384 % 256 != 0), shared bias + mask.
    b5, h5, l5, d5 = 1, 2, 384, 64
    k5 = jax.random.split(key, 6)
    Q5 = jax.random.normal(k5[0], (b5, h5, l5, d5), dtype=jnp.float32)
    K5 = jax.random.normal(k5[1], (b5, h5, l5, d5), dtype=jnp.float32)
    V5 = jax.random.normal(k5[2], (b5, h5, l5, d5), dtype=jnp.float32)
    bias5 = 0.1 * jax.random.normal(k5[3], (b5, l5, l5), dtype=jnp.float32)
    mask5 = (jax.random.uniform(k5[4], (b5, l5)) > 0.2).astype(jnp.float32)
    mask5 = mask5.at[:, 0].set(1.0)
    out5 = jax.block_until_ready(
        self_attention(Q5, K5, V5, mask5, bias5,
                       query_block=128, kv_block=256))
    ref5 = _reference(Q5, K5, V5, mask5, bias5)
    assert jnp.allclose(out5, ref5, atol=2e-3, rtol=2e-3), "mismatch (stream)"

    # 6) optional bf16-MXU path for f32 inputs (looser tolerance)
    out6 = jax.block_until_ready(self_attention(Q, K, V, matmul_in_bf16=True))
    assert jnp.allclose(out6, ref2, atol=5e-2, rtol=5e-2), "mismatch (bf16 mxu)"

    print("KERNEL_OK")
</pallas_src>

<mosaic_0001>
module attributes {stable_mosaic.version = 11 : i64} {
  func.func @kernel(%arg0: i32, %arg1: i32, %arg2: i32, %arg3: memref<1x8x32xf32, #tpu.memory_space<vmem>>, %arg4: memref<1x8x32xf32, #tpu.memory_space<vmem>>, %arg5: memref<1x8x32xf32, #tpu.memory_space<vmem>>, %arg6: memref<1x8x8xf32, #tpu.memory_space<vmem>>, %arg7: memref<1x8x32xf32, #tpu.memory_space<vmem>>, %arg8: memref<8x1xf32, #tpu.memory_space<vmem>>, %arg9: memref<8x1xf32, #tpu.memory_space<vmem>>, %arg10: memref<8x32xf32, #tpu.memory_space<vmem>>) attributes {dimension_semantics = [#tpu.dimension_semantics<parallel>, #tpu.dimension_semantics<arbitrary>, #tpu.dimension_semantics<arbitrary>], iteration_bounds = array<i64: 4, 1, 1>, scalar_prefetch = 0 : i64, scratch_operands = 3 : i64, tpu.core_type = #tpu.core_type<tc>, window_params = [{transform_indices = @transform_0, window_bounds = array<i64: 1, 8, 32>}, {transform_indices = @transform_1, window_bounds = array<i64: 1, 8, 32>}, {transform_indices = @transform_2, window_bounds = array<i64: 1, 8, 32>}, {transform_indices = @transform_3, window_bounds = array<i64: 1, 8, 8>}, {transform_indices = @transform_4, window_bounds = array<i64: 1, 8, 32>}]} {
    %c0_i32 = arith.constant 0 : i32
    %0 = arith.cmpi eq, %arg2, %c0_i32 : i32
    %1 = arith.extui %0 : i1 to i32
    %c0_i32_0 = arith.constant 0 : i32
    %2 = arith.cmpi ne, %1, %c0_i32_0 : i32
    scf.if %2 {
      %cst_30 = arith.constant -1.000000e+30 : f32
      %40 = vector.broadcast %cst_30 : f32 to vector<8x1xf32>
      %c0_31 = arith.constant 0 : index
      %c0_32 = arith.constant 0 : index
      %41 = vector.load %arg8[%c0_31, %c0_32] : memref<8x1xf32, #tpu.memory_space<vmem>>, vector<8x1xf32>
      tpu.vector_store %arg8[%c0_31, %c0_32], %40 {strides = array<i32>} : memref<8x1xf32, #tpu.memory_space<vmem>>, vector<8x1xf32>,
      %cst_33 = arith.constant 0.000000e+00 : f32
      %42 = vector.broadcast %cst_33 : f32 to vector<8x1xf32>
      %c0_34 = arith.constant 0 : index
      %c0_35 = arith.constant 0 : index
      %43 = vector.load %arg9[%c0_34, %c0_35] : memref<8x1xf32, #tpu.memory_space<vmem>>, vector<8x1xf32>
      tpu.vector_store %arg9[%c0_34, %c0_35], %42 {strides = array<i32>} : memref<8x1xf32, #tpu.memory_space<vmem>>, vector<8x1xf32>,
      %cst_36 = arith.constant 0.000000e+00 : f32
      %44 = vector.broadcast %cst_36 : f32 to vector<8x32xf32>
      %c0_37 = arith.constant 0 : index
      %c0_38 = arith.constant 0 : index
      %45 = vector.load %arg10[%c0_37, %c0_38] : memref<8x32xf32, #tpu.memory_space<vmem>>, vector<8x32xf32>
      tpu.vector_store %arg10[%c0_37, %c0_38], %44 {strides = array<i32>} : memref<8x32xf32, #tpu.memory_space<vmem>>, vector<8x32xf32>,
    } else {
    }
    %c0 = arith.constant 0 : index
    %c0_1 = arith.constant 0 : index
    %c0_2 = arith.constant 0 : index
    %3 = vector.load %arg3[%c0, %c0_1, %c0_2] : memref<1x8x32xf32, #tpu.memory_space<vmem>>, vector<1x8x32xf32>
    %4 = vector.shape_cast %3 : vector<1x8x32xf32> to vector<8x32xf32>
    %c0_3 = arith.constant 0 : index
    %c0_4 = arith.constant 0 : index
    %c0_5 = arith.constant 0 : index
    %5 = vector.load %arg4[%c0_3, %c0_4, %c0_5] : memref<1x8x32xf32, #tpu.memory_space<vmem>>, vector<1x8x32xf32>
    %6 = vector.shape_cast %5 : vector<1x8x32xf32> to vector<8x32xf32>
    %c0_6 = arith.constant 0 : index
    %c0_7 = arith.constant 0 : index
    %c0_8 = arith.constant 0 : index
    %7 = vector.load %arg5[%c0_6, %c0_7, %c0_8] : memref<1x8x32xf32, #tpu.memory_space<vmem>>, vector<1x8x32xf32>
    %8 = vector.shape_cast %7 : vector<1x8x32xf32> to vector<8x32xf32>
    %cst = arith.constant 0.176776692 : f32
    %9 = vector.broadcast %cst : f32 to vector<8x32xf32>
    %10 = arith.mulf %4, %9 : vector<8x32xf32>
    %cst_9 = arith.constant dense<0.000000e+00> : vector<8x8xf32>
    %11 = tpu.matmul %10, %6, %cst_9 {dimension_numbers = #tpu.dot_dimension_numbers<[1], [1], [0], [0], [0, 0, 1, 0], [], []>} : vector<8x32xf32>, vector<8x32xf32>, vector<8x8xf32> -> vector<8x8xf32>
    %c0_10 = arith.constant 0 : index
    %c0_11 = arith.constant 0 : index
    %c0_12 = arith.constant 0 : index
    %12 = vector.load %arg6[%c0_10, %c0_11, %c0_12] : memref<1x8x8xf32, #tpu.memory_space<vmem>>, vector<1x8x8xf32>
    %13 = vector.shape_cast %12 : vector<1x8x8xf32> to vector<8x8xf32>
    %14 = arith.addf %11, %13 : vector<8x8xf32>
    %c0_13 = arith.constant 0 : index
    %c0_14 = arith.constant 0 : index
    %15 = vector.load %arg8[%c0_13, %c0_14] : memref<8x1xf32, #tpu.memory_space<vmem>>, vector<8x1xf32>
    %cst_15 = arith.constant dense<0xFF800000> : vector<8xf32>
    %16 = vector.multi_reduction <maximumf>, %14, %cst_15 [1] : vector<8x8xf32> to vector<8xf32>
    %17 = vector.shape_cast %16 : vector<8xf32> to vector<8x1xf32>
    %18 = arith.maximumf %15, %17 : vector<8x1xf32>
    %19 = arith.subf %15, %18 : vector<8x1xf32>
    %20 = math.exp %19 : vector<8x1xf32>
    %21 = vector.broadcast %18 : vector<8x1xf32> to vector<8x8xf32>
    %22 = arith.subf %14, %21 : vector<8x8xf32>
    %23 = math.exp %22 : vector<8x8xf32>
    %c0_16 = arith.constant 0 : index
    %c0_17 = arith.constant 0 : index
    %24 = vector.load %arg9[%c0_16, %c0_17] : memref<8x1xf32, #tpu.memory_space<vmem>>, vector<8x1xf32>
    %25 = arith.mulf %20, %24 : vector<8x1xf32>
    %cst_18 = arith.constant dense<0.000000e+00> : vector<8xf32>
    %26 = vector.multi_reduction <add>, %23, %cst_18 [1] : vector<8x8xf32> to vector<8xf32>
    %27 = vector.shape_cast %26 : vector<8xf32> to vector<8x1xf32>
    %28 = arith.addf %25, %27 : vector<8x1xf32>
    %c0_19 = arith.constant 0 : index
    %c0_20 = arith.constant 0 : index
    %29 = vector.load %arg9[%c0_19, %c0_20] : memref<8x1xf32, #tpu.memory_space<vmem>>, vector<8x1xf32>
    tpu.vector_store %arg9[%c0_19, %c0_20], %28 {strides = array<i32>} : memref<8x1xf32, #tpu.memory_space<vmem>>, vector<8x1xf32>,
    %c0_21 = arith.constant 0 : index
    %c0_22 = arith.constant 0 : index
    %30 = vector.load %arg10[%c0_21, %c0_22] : memref<8x32xf32, #tpu.memory_space<vmem>>, vector<8x32xf32>
    %31 = vector.broadcast %20 : vector<8x1xf32> to vector<8x32xf32>
    %32 = arith.mulf %31, %30 : vector<8x32xf32>
    %cst_23 = arith.constant dense<0.000000e+00> : vector<8x32xf32>
    %33 = tpu.matmul %23, %8, %cst_23 {dimension_numbers = #tpu.dot_dimension_numbers<[1], [0], [0], [1], [0, 0, 1, 1], [], []>} : vector<8x8xf32>, vector<8x32xf32>, vector<8x32xf32> -> vector<8x32xf32>
    %34 = arith.addf %32, %33 : vector<8x32xf32>
    %c0_24 = arith.constant 0 : index
    %c0_25 = arith.constant 0 : index
    %35 = vector.load %arg10[%c0_24, %c0_25] : memref<8x32xf32, #tpu.memory_space<vmem>>, vector<8x32xf32>
    tpu.vector_store %arg10[%c0_24, %c0_25], %34 {strides = array<i32>} : memref<8x32xf32, #tpu.memory_space<vmem>>, vector<8x32xf32>,
    %c0_26 = arith.constant 0 : index
    %c0_27 = arith.constant 0 : index
    %36 = vector.load %arg8[%c0_26, %c0_27] : memref<8x1xf32, #tpu.memory_space<vmem>>, vector<8x1xf32>
    tpu.vector_store %arg8[%c0_26, %c0_27], %18 {strides = array<i32>} : memref<8x1xf32, #tpu.memory_space<vmem>>, vector<8x1xf32>,
    %c0_i32_28 = arith.constant 0 : i32
    %37 = arith.cmpi eq, %arg2, %c0_i32_28 : i32
    %38 = arith.extui %37 : i1 to i32
    %c0_i32_29 = arith.constant 0 : i32
    %39 = arith.cmpi ne, %38, %c0_i32_29 : i32
    scf.if %39 {
      %c0_30 = arith.constant 0 : index
      %c0_31 = arith.constant 0 : index
      %40 = vector.load %arg10[%c0_30, %c0_31] : memref<8x32xf32, #tpu.memory_space<vmem>>, vector<8x32xf32>
      %c0_32 = arith.constant 0 : index
      %c0_33 = arith.constant 0 : index
      %41 = vector.load %arg9[%c0_32, %c0_33] : memref<8x1xf32, #tpu.memory_space<vmem>>, vector<8x1xf32>
      %42 = tpu.reciprocal %41 {approx = true} : vector<8x1xf32> -> vector<8x1xf32>
      %43 = vector.broadcast %42 : vector<8x1xf32> to vector<8x32xf32>
      %44 = arith.mulf %40, %43 : vector<8x32xf32>
      %c0_34 = arith.constant 0 : index
      %c0_35 = arith.constant 0 : index
      %c0_36 = arith.constant 0 : index
      %45 = vector.load %arg7[%c0_34, %c0_35, %c0_36] : memref<1x8x32xf32, #tpu.memory_space<vmem>>, vector<1x8x32xf32>
      %46 = vector.shape_cast %45 : vector<1x8x32xf32> to vector<8x32xf32>
      %47 = vector.shape_cast %44 : vector<8x32xf32> to vector<1x8x32xf32>
      tpu.vector_store %arg7[%c0_34, %c0_35, %c0_36], %47 {strides = array<i32>} : memref<1x8x32xf32, #tpu.memory_space<vmem>>, vector<1x8x32xf32>,
    } else {
    }
    return
  }
  func.func @transform_0(%arg0: i32, %arg1: i32, %arg2: i32) -> (i32, i32, i32) {
    %c0_i32 = arith.constant 0 : i32
    %c0_i32_0 = arith.constant 0 : i32
    return %arg0, %arg1, %c0_i32 : i32, i32, i32
  }
  func.func @transform_1(%arg0: i32, %arg1: i32, %arg2: i32) -> (i32, i32, i32) {
    %c0_i32 = arith.constant 0 : i32
    %c0_i32_0 = arith.constant 0 : i32
    return %arg0, %arg2, %c0_i32 : i32, i32, i32
  }
  func.func @transform_2(%arg0: i32, %arg1: i32, %arg2: i32) -> (i32, i32, i32) {
    %c0_i32 = arith.constant 0 : i32
    %c0_i32_0 = arith.constant 0 : i32
    return %arg0, %arg2, %c0_i32 : i32, i32, i32
  }
  func.func @transform_3(%arg0: i32, %arg1: i32, %arg2: i32) -> (i32, i32, i32) {
    %c0_i32 = arith.constant 0 : i32
    return %arg0, %arg1, %arg2 : i32, i32, i32
  }
  func.func @transform_4(%arg0: i32, %arg1: i32, %arg2: i32) -> (i32, i32, i32) {
    %c0_i32 = arith.constant 0 : i32
    %c0_i32_0 = arith.constant 0 : i32
    return %arg0, %arg1, %c0_i32 : i32, i32, i32
  }
}

</mosaic_0001>

<bundles_post_ra>
// kernel: self_attention.1
= control target key start
LH: loop header
LB: loop body
LE: loop exit
PB: predicated region body
PF: predicated region fallthrough
CT: control target
= control target key end

     0   :  { %9 = vsyncpa [#allocation6], 0  ;;  %s977_s0 = inlined_call_operand.vmem [shape: f32[4,8,32], index: 0, kind: input, shape index: {}]   ;;  %s978_s1 = inlined_call_operand.vmem [shape: f32[4,8,32], index: 1, kind: input, shape index: {}]   ;;  %s979_s2 = inlined_call_operand.hbm [shape: f32[4,8,32], index: 2, kind: input, shape index: {}]   ;;  %s980_s3 = inlined_call_operand.vmem [shape: f32[4,8,8], index: 3, kind: input, shape index: {}]   ;;  %s981_s4 = inlined_call_operand.hbm [shape: f32[4,8,32], index: 4, kind: output, shape index: {}]  }
   0x1   :  { %11 = vsyncpa [#allocation6 + $0x1], 0 }
   0x2   :  { %12 = vsyncpa [#allocation7], 0 }
   0x3   :  { %14 = vsyncpa [#allocation7 + $0x1], 0  ;;  %s829_s15 = smov 0   ;;  %s831_s16 = smov 0  }
   0x4   :  { %s833_s17 = smov 0   ;;  %s835_s18 = smov 0  }
   0x5   :  { %s837_s19 = smov 0   ;;  %s839_s20 = smov 0  }
   0x6 LB: > { %s594_s21 = sadd.s32 4294967295, %s799_s20   ;;  %s595_s22 = sadd.s32 4294967294, %s799_s20   ;;  %s799_s20 = sphi %s839_s20, %s20_s20   ;;  %s795_s19 = sphi %s837_s19, %s990_s19   ;;  %s791_s18 = sphi %s835_s18, %s989_s18   ;;  %s787_s17 = sphi %s833_s17, %s988_s17   ;;  %s783_s16 = sphi %s831_s16, %s987_s16   ;;  %s779_s15 = sphi %s829_s15, %s986_s15  }
   0x7   : > { %s39_s23 = sadd.s32 1, %s795_s19  ;;  %s104_s24 = sadd.s32 1, %s787_s17 }
   0x8   : > { %p41_p0 = scmp.ge.s32.totalorder %s39_s23, 4  ;;  %p111_p1 = scmp.ne.s32.totalorder %s787_s17, %s783_s16 }
   0x9   : > { %p112_p2 = scmp.eq.s32.totalorder %s799_s20, 0  ;;  %p117_p3 = scmp.ne.s32.totalorder %s783_s16, %s779_s15 }
   0xa   : > { %s992_s23 = smov (%p41_p0, %s39_s23), 0  ;;  %p118_p5 = scmp.eq.s32.totalorder %s594_s21, 0 }
   0xb   : > { %p870_p4 = por %p112_p2, %p111_p1  ;;  %s99_s26 = ssub.s32 %s795_s19, %s992_s23 }
   0xc   : > { %p173_p6 = scmp.eq.s32.totalorder %s594_s21, 3  ;;  %p102_p7 = scmp.eq.s32.totalorder %s99_s26, 0 }
   0xd   : > { %p876_p8 = por %p118_p5, %p117_p3  ;;  %p179_p10 = scmp.eq.s32.totalorder %s595_s22, 3 }
   0xe   : > { %p880_p9 = por %p173_p6, %p111_p1  ;;  %p625_p12 = scmp.lt.s32.totalorder %s799_s20, 4 }
   0xf   : > { %s885_s29 = scalar_select %p102_p7, %s787_s17, %s104_s24  }
  0x10   : > { %p887_p11 = por %p179_p10, %p117_p3  ;;  %s219_s5 = sand.u32 1, %s787_s17  }
  0x11   : > { %s598_s6 = sshll.u32 %s219_s5, 3  ;;  %s599_s7 = sshll.u32 %s795_s19, 3 }
  0x12   : > { %s228_s10 = scalar_lea.hbm %s979_s2, %s599_s7  ;;  %s223_s11 = scalar_lea.vmem [#allocation5], %s598_s6 }
  0x13   : > { %s232_s12 = sshll.u32 %s223_s11, 4  ;;  %s230_s13 = sshll.u32 %s228_s10, 4  ;;  %s233_s12 = int_to_ptr.vmem [resolvable:$true] %s232_s12  ;;  %s231_s13 = int_to_ptr.hbm [resolvable:$true] %s230_s13 }
  0x14   : > { %p618_p13 = pnand %p625_p12, %p870_p4  ;;  %p600_p0 = scmp.ge.s32.totalorder %s799_s20, 1 }
  0x15   : > { %p250_p1 = scmp.lt.s32.totalorder %s799_s20, 5  ;;  %s220_s14 = scalar_lea.sflag [#allocation6], %s219_s5 }
  0x16   : > { %620 = dma.hbm_to_vmem [thread:$0]  (!%p618_p13), %s231_s13, 128, %s233_s12, %s220_s14  }
  0x17   : > { %p251_p2 = pnand %p600_p0, %p250_p1 }
  0x18   : > { %s902_s21 = sand.u32 (!%p251_p2), 1, %s783_s16  }
  0x19   : > { %254 = sbr.rel (%p251_p2) target bundleno = 644 (0x284), region = 36  ;;  %s601_s22 = sshll.u32 (!%p251_p2), %s902_s21, 3 }
  0x1a   : > { %s257_s24 = scalar_lea.sflag (!%p251_p2), [#allocation6], %s902_s21  ;;  %s908_s26 = scalar_lea.vmem (!%p251_p2), [#allocation5], %s601_s22 }
  0x1e   : > { %770 = dma.done.wait (%p876_p8), %s257_s24, 128  }
  0x1f   : > { %772 = vsyncadd (%p876_p8), %s257_s24, 4294967168  ;;  %p310_p3 = scmp.lt.s32.totalorder %s791_s18, 3  ;;  %vm341_vm0 = vcmask 261120   ;;  %v801_v0 = vmov 0.0   ;;  %vm338_vm1 = vcmask 7168   ;;  %vm376_vm2 = vcmask 64512  }
  0x20   : > { %342 = vst.msk [vmem:[#allocation4] sm:$0xff] %vm341_vm0, %v801_v0  ;;  %v802_v4 = vmov -1e+30   ;;  %v803_v9 = vmov 0   ;;  %v345_v14 = vld [vmem:[%s908_s26] sm:$0xff]  ;;  %s610_s14 = sshll.u32 %s791_s18, 3 }
  0x21   : > { %s311_s25 = scalar_select %p310_p3, %s791_s18, 3  ;;  %339 = vst.msk [vmem:[#allocation2] sm:$0xff] %vm338_vm1, %v802_v4  ;;  %678 = vset.pattern.permute.xlu0 %v803_v9  ;;  %679 = vset.pattern.permute.xlu1 %v803_v9 }
  0x22   : > { %340 = vst.msk [vmem:[#allocation3] sm:$0xff] %vm338_vm1, %v801_v0  ;;  %680 = vset.pattern.permute.xlu2 %v803_v9  ;;  %425 = vmatpush.msra.mxu1 %v345_v14 }
  0x23   : > { %s603_s5 = sshll.u32 %s311_s25, 3  ;;  %s458_s25 = scalar_lea.hbm %s981_s4, %s610_s14 }
  0x24   : > { %s323_s8 = scalar_lea.vmem %s978_s1, %s603_s5  ;;  %s316_s11 = scalar_lea.vmem %s977_s0, %s603_s5 }
  0x25   : > { %v344_v1 = vld [vmem:[%s323_s8] sm:$0xff]  ;;  %s333_s13 = scalar_lea.vmem %s980_s3, %s603_s5  ;;  %s309_s5 = scalar_lea.vmem [#allocation8], %s601_s22 }
  0x26   : > { %v343_v2 = vld [vmem:[%s316_s11] sm:$0xff]  ;;  %606 = vmatpush.xpose.msk.msra.mxu0 %vm341_vm0, %v344_v1  ;;  %s460_s6 = sshll.u32 %s309_s5, 4  ;;  %s462_s7 = sshll.u32 %s458_s25, 4  ;;  %s461_s6 = int_to_ptr.vmem [resolvable:$true] %s460_s6  ;;  %s463_s7 = int_to_ptr.hbm [resolvable:$true] %s462_s7 }
  0x27   : > { %v346_v3 = vmul.f32 0.17677669, %v343_v2  ;;  %v347_v5 = vld [vmem:[%s333_s13] sm:$0xff]  ;;  %v400_v28 = vld [vmem:[#allocation4] sm:$0xff]  ;;  %s447_s8 = scalar_lea.sflag [#allocation7], %s902_s21  ;;  %s731_s9 = sshra.s32 %s463_s7, 4  ;;  %s732_s9 = int_to_ptr.hbm [resolvable:$true] %s731_s9 }
  0x28   : > { %v375_v10 = vld [vmem:[#allocation2] sm:$0xff]  ;;  %s733_s18 = scalar_lea.hbm %s732_s9, 8  ;;  %s737_s22 = scalar_lea.hbm %s981_s4, 32 }
  0x29   : > { %607 = vmatmul.msk.f32.vlgmr.msra.gmra.mxu0 %vm341_vm0, %v346_v3  ;;  %v392_v22 = vld [vmem:[#allocation3] sm:$0xff]  ;;  %p734_p4 = scmp.ne.s32.totalorder %s732_s9, %s733_s18  ;;  %p738_p7 = scmp.lt.s32.totalorder %s732_s9, %s981_s4 }
  0x2a   : > { %p739_p8 = scmp.lt.s32.totalorder %s737_s22, %s733_s18 }
  0x2b   : > { %p735_p5 = pnand %p734_p4, %p880_p9 }
  0x2c   : > { %p740_p10 = por %p739_p8, %p738_p7 }
  0x2d   : > { %p736_p6 = pneg %p735_p5 }
  0x2f   : > { %p741_p12 = pnand %p740_p10, %p736_p6 }
  0xa6   : > { %v372_v6 = vpop.f32.mrf.mxu0 }
  0xa7   : > { %v373_v7 = vadd.f32 %v372_v6, %v347_v5 }
  0xa9   : > { %v377_v8 = vsel %vm376_vm2, %v373_v7, -inf }
  0xaa   : > { %378 = vmax.xlane.f32.xlu0 %v377_v8 }
 0x11d   : > { %v379_v11 = vpop.xlane.xlu0 %378 }
 0x11e   : > { %v380_v12 = vmax.f32 %v375_v10, %v379_v11 }
 0x120   : > { %v381_v13 = vsub.f32 %v375_v10, %v380_v12  ;;  %432 = vst.msk [vmem:[#allocation2] sm:$0xff] %vm338_vm1, %v380_v12  ;;  %386 = vperm.xlu0 %678, %v380_v12  }
 0x122   : > { %v382_v20 = vmul.f32 1.442695, %v381_v13 }
 0x192   : > { %v387_v15 = vpop.permute.xlu0 %386 }
 0x193   : > { %v389_v16 = vsub.f32 %v373_v7, %v387_v15 }
 0x195   : > { %v390_v17 = vmul.f32 1.442695, %v389_v16 }
 0x197   : > { %681 = vpow2.f32 %v390_v17 }
 0x198   : > { %683 = vpow2.f32 %v382_v20 }
 0x19d   : > { %v682_v18 = vpop.eup %681 }
 0x19e   : > { %608 = vmatmul.msk.f32.vlgmr.msra.gmra.mxu1 %vm376_vm2, %v682_v18  ;;  %v394_v19 = vsel %vm376_vm2, %v682_v18, 0.0  ;;  %v684_v21 = vpop.eup %683 }
 0x19f   : > { %395 = vadd.xlane.f32.xlu1 %v394_v19  ;;  %v393_v23 = vmul.f32 %v684_v21, %v392_v22 }
 0x1b8   : > { %403 = vperm.xlu1 %679, %v684_v21  }
 0x212   : > { %v396_v24 = vpop.xlane.xlu1 %395 }
 0x213   : > { %v397_v25 = vadd.f32 %v396_v24, %v393_v23 }
 0x215   : > { %399 = vst.msk [vmem:[#allocation3] sm:$0xff] %vm338_vm1, %v397_v25 }
 0x21b   : > { %v427_v31 = vpop.f32.mrf.mxu1 }
 0x21c   : > { %v437_v26 = vld [vmem:[#allocation3] sm:$0xff] }
 0x21d   : > { %685 = vrcp.f32 %v437_v26 }
 0x223   : > { %v686_v27 = vpop.eup %685 }
 0x224   : > { %441 = vperm.xlu2 %680, %v686_v27  }
 0x22a   : > { %v404_v29 = vpop.permute.xlu1 %403 }
 0x22b   : > { %v406_v30 = vmul.f32 %v404_v29, %v400_v28 }
 0x22d   : > { %v430_v32 = vadd.f32 %v427_v31, %v406_v30 }
 0x22f   : > { %431 = vst.msk [vmem:[#allocation4] sm:$0xff] %vm341_vm0, %v430_v32 }
 0x236   : > { %v436_v33 = vld [vmem:[#allocation4] sm:$0xff] }
 0x27e   : > { %v442_v34 = vpop.permute.xlu2 %441 }
 0x27f   : > { %v444_v35 = vmul.f32 %v442_v34, %v436_v33 }
 0x281   : > { %445 = vst.msk [vmem:[%s309_s5] sm:$0xff] %vm341_vm0, %v444_v35 }
 0x282   : > { %744 = shalt.err (!%p741_p12)
}
 0x283   : > { %615 = dma.vmem_to_hbm [thread:$0]  (%p880_p9), %s461_s6, 128, %s463_s7, %s447_s8  }
 0x284 PF: > { %p626_p13 = scmp.ge.s32.totalorder %s799_s20, 2  ;;  %s474_s21 = sand.u32 1, %s779_s15  }
 0x285   : > { %s475_s13 = scalar_lea.sflag [#allocation7], %s474_s21 }
 0x286   : > { %p622_p0 = pnand %p626_p13, %p887_p11 }
 0x288   : > { %p623_p1 = pneg %p622_p0 }
 0x28a   : > { %774 = dma.done.wait (%p623_p1), %s475_s13, 128  }
 0x28b   : > { %776 = vsyncadd (%p623_p1), %s475_s13, 4294967168  ;;  %s20_s20 = sadd.s32 1, %s799_s20   ;;  %s986_s15 = smov %s783_s16 }
 0x28c   : > { %p17_p2 = scmp.ge.s32.totalorder %s20_s20, 6   ;;  %s987_s16 = smov %s787_s17 }
 0x28d   : > { %s988_s17 = smov %s885_s29  ;;  %s989_s18 = smov %s795_s19 }
 0x28e   : > { %s990_s19 = smov %s992_s23  ;;  %19 = sbr.rel (!%p17_p2) target bundleno = 6 (0x6), region = 98 }
 0x293   :  { %481 = vsyncpa [#allocation6], 1 }
 0x294   :  { %483 = vsyncpa [#allocation6 + $0x1], 1 }
 0x295   :  { %484 = vsyncpa [#allocation7], 1 }
 0x296   :  { %486 = vsyncpa [#allocation7 + $0x1], 1 }

</bundles_post_ra>
